<compile_context>
chip_gen: v7x
topology: tpu7x:2x2x1
jax: 0.10.0
libtpu: 0.0.40
codegen_flags: <defaults>
</compile_context>

<pallas_src>
import jax
import jax.numpy as jnp
from jax import lax
from jax.experimental import pallas as pl
from jax.experimental.pallas import tpu as pltpu

EPS = 1e-5  # nn.LayerNorm default


def swin_up_kernel(x_ref, gamma_ref, beta_ref, w_ref, b_ref, o_ref):
    # x_ref    : (1, tL, C)   f32   input rows, tL = tile_rows * W
    # gamma_ref: (1, C)       f32   LayerNorm weight
    # beta_ref : (1, C)       f32   LayerNorm bias
    # w_ref    : (C, 2C)      bf16  Linear weight (transposed, in-features major)
    # b_ref    : (1, 2C)      f32   Linear bias
    # o_ref    : (1, 2, tH, 2W, Ch) f32
    tH = o_ref.shape[2]
    Wd = o_ref.shape[3] // 2
    Ch = o_ref.shape[4]

    x = x_ref[0].astype(jnp.float32)                       # (tL, C)

    # ---- LayerNorm over channels (f32, two-pass centered variance) ----
    mean = jnp.mean(x, axis=-1, keepdims=True)
    xc = x - mean
    var = jnp.mean(xc * xc, axis=-1, keepdims=True)
    xn = xc * lax.rsqrt(var + EPS) * gamma_ref[...] + beta_ref[...]

    # ---- Linear C -> 2C on the MXU: bf16 operands, f32 accumulation ----
    y = jnp.dot(xn.astype(jnp.bfloat16), w_ref[...],
                preferred_element_type=jnp.float32) + b_ref[...]    # (tL, 2C)

    # ---- quadrant rearrange: channel chunk s = qh + 2*qw -> quadrant (qh, qw) ----
    y3 = y.reshape(tH, Wd, 4 * Ch)                         # (tH, W, 2C)

    def quad(s):
        return y3[:, :, s * Ch:(s + 1) * Ch]               # (tH, W, Ch)

    top = jnp.concatenate([quad(0), quad(2)], axis=1)      # rows h     : [x0 | x2]
    bot = jnp.concatenate([quad(1), quad(3)], axis=1)      # rows H + h : [x1 | x3]
    o_ref[0, 0] = top.astype(o_ref.dtype)
    o_ref[0, 1] = bot.astype(o_ref.dtype)


def _pick_tile_rows(H, W, C, budget_bytes=4 << 20):
    """Largest divisor tH of H whose per-step (input + output) block fits the budget."""
    bytes_per_row = W * C * 4 * 3     # f32 input row + 2x-sized f32 output row
    cands = [t for t in range(1, H + 1)
             if H % t == 0 and ((t * W) % 8 == 0 or t == H)]
    fitting = [t for t in cands if t * bytes_per_row <= budget_bytes]
    return max(fitting) if fitting else min(cands)


def swin_up(x, H, W, ln_weight, ln_bias, up_weight, up_bias):
    """x: (B, H*W, C). up_weight: (2C, C) torch layout. Returns (B, 4HW, C//2) f32."""
    B, L, C = x.shape
    assert L == H * W, "input feature has wrong size"
    assert C % 2 == 0
    Ch = C // 2
    C2 = 2 * C

    tH = _pick_tile_rows(H, W, C)
    tL = tH * W

    w_t = jnp.transpose(up_weight).astype(jnp.bfloat16)    # (C, 2C)
    b2 = up_bias.reshape(1, C2).astype(jnp.float32)
    g2 = ln_weight.reshape(1, C).astype(jnp.float32)
    be2 = ln_bias.reshape(1, C).astype(jnp.float32)

    # VMEM budget sized to the actual double-buffered blocks (+ headroom),
    # capped well below v7x's 64 MiB physical VMEM.
    in_block = tL * C * 4
    out_block = 2 * tH * 2 * W * Ch * 4
    w_bytes = C * C2 * 2
    vmem_limit = int(min(max(4 * (in_block + out_block) + 4 * w_bytes + (8 << 20),
                             16 << 20), 48 << 20))

    out5 = pl.pallas_call(
        swin_up_kernel,
        out_shape=jax.ShapeDtypeStruct((B, 2, H, 2 * W, Ch), jnp.float32),
        grid_spec=pltpu.PrefetchScalarGridSpec(
            num_scalar_prefetch=0,
            grid=(B, H // tH),
            in_specs=[
                pl.BlockSpec((1, tL, C), lambda b, i: (b, i, 0)),
                pl.BlockSpec((1, C), lambda b, i: (0, 0)),
                pl.BlockSpec((1, C), lambda b, i: (0, 0)),
                pl.BlockSpec((C, C2), lambda b, i: (0, 0)),
                pl.BlockSpec((1, C2), lambda b, i: (0, 0)),
            ],
            out_specs=pl.BlockSpec((1, 2, tH, 2 * W, Ch),
                                   lambda b, i: (b, 0, i, 0, 0)),
        ),
        compiler_params=pltpu.CompilerParams(
            dimension_semantics=("parallel", "parallel"),
            vmem_limit_bytes=vmem_limit,
        ),
    )(x.astype(jnp.float32), g2, be2, w_t, b2)

    # (B, 2, H, 2W, Ch) row-major == (B, 2H, 2W, Ch) row-major -> metadata-only reshape.
    return out5.reshape(B, 4 * H * W, Ch)


def _reference(x, H, W, ln_w, ln_b, up_w, up_b):
    """Pure-JAX reference mirroring the PyTorch SwinUp.forward."""
    B, L, C = x.shape
    Ch = C // 2
    mean = jnp.mean(x, axis=-1, keepdims=True)
    var = jnp.mean((x - mean) ** 2, axis=-1, keepdims=True)
    xn = (x - mean) / jnp.sqrt(var + EPS) * ln_w + ln_b
    y = xn @ up_w.T + up_b                                  # (B, L, 2C)
    y = y.reshape(B, H, W, 2 * C)
    x0 = y[..., 0:Ch]
    x1 = y[..., Ch:2 * Ch]
    x2 = y[..., 2 * Ch:3 * Ch]
    x3 = y[..., 3 * Ch:4 * Ch]
    left = jnp.concatenate([x0, x1], axis=1)                # (B, 2H, W, Ch)
    right = jnp.concatenate([x2, x3], axis=1)               # (B, 2H, W, Ch)
    out = jnp.concatenate([left, right], axis=2)            # (B, 2H, 2W, Ch)
    return out.reshape(B, -1, Ch)


if __name__ == "__main__":
    # Small shapes consistent with the module: dim even, H*W sequence length.
    B, H, W, dim = 2, 8, 8, 64
    Ch = dim // 2

    key = jax.random.PRNGKey(0)
    kx, kw, kb, kg, kbe = jax.random.split(key, 5)
    x = jax.random.normal(kx, (B, H * W, dim), dtype=jnp.float32)
    up_w = jax.random.normal(kw, (2 * dim, dim), dtype=jnp.float32) / jnp.sqrt(dim)
    up_b = 0.1 * jax.random.normal(kb, (2 * dim,), dtype=jnp.float32)
    ln_w = 1.0 + 0.1 * jax.random.normal(kg, (dim,), dtype=jnp.float32)
    ln_b = 0.1 * jax.random.normal(kbe, (dim,), dtype=jnp.float32)

    out = swin_up(x, H, W, ln_w, ln_b, up_w, up_b)
    out = jax.block_until_ready(out)

    ref = _reference(x, H, W, ln_w, ln_b, up_w, up_b)
    assert out.shape == (B, 4 * H * W, Ch), out.shape
    # bf16 matmul operands (f32 accumulation) -> loosened tolerance vs f32 reference.
    err = float(jnp.max(jnp.abs(out - ref)))
    assert err < 5e-2, err
    print("KERNEL_OK")
</pallas_src>

<mosaic_0001>
module attributes {stable_mosaic.version = 11 : i64} {
  func.func @swin_up_kernel(%arg0: i32, %arg1: i32, %arg2: memref<1x64x64xf32, #tpu.memory_space<vmem>>, %arg3: memref<1x64xf32, #tpu.memory_space<vmem>>, %arg4: memref<1x64xf32, #tpu.memory_space<vmem>>, %arg5: memref<64x128xbf16, #tpu.memory_space<vmem>>, %arg6: memref<1x128xf32, #tpu.memory_space<vmem>>, %arg7: memref<1x2x8x16x32xf32, #tpu.memory_space<vmem>>) attributes {dimension_semantics = [#tpu.dimension_semantics<parallel>, #tpu.dimension_semantics<parallel>], iteration_bounds = array<i64: 2, 1>, scalar_prefetch = 0 : i64, scratch_operands = 0 : i64, tpu.core_type = #tpu.core_type<tc>, window_params = [{transform_indices = @transform_0, window_bounds = array<i64: 1, 64, 64>}, {pipeline_mode = #tpu.pipeline_mode<synchronous>, transform_indices = @transform_1, window_bounds = array<i64: 1, 64>}, {pipeline_mode = #tpu.pipeline_mode<synchronous>, transform_indices = @transform_2, window_bounds = array<i64: 1, 64>}, {pipeline_mode = #tpu.pipeline_mode<synchronous>, transform_indices = @transform_3, window_bounds = array<i64: 64, 128>}, {pipeline_mode = #tpu.pipeline_mode<synchronous>, transform_indices = @transform_4, window_bounds = array<i64: 1, 128>}, {transform_indices = @transform_5, window_bounds = array<i64: 1, 2, 8, 16, 32>}]} {
    %c0 = arith.constant 0 : index
    %c0_0 = arith.constant 0 : index
    %c0_1 = arith.constant 0 : index
    %0 = vector.load %arg2[%c0, %c0_0, %c0_1] : memref<1x64x64xf32, #tpu.memory_space<vmem>>, vector<1x64x64xf32>
    %1 = vector.shape_cast %0 : vector<1x64x64xf32> to vector<64x64xf32>
    %cst = arith.constant dense<0.000000e+00> : vector<64xf32>
    %2 = vector.multi_reduction <add>, %1, %cst [1] : vector<64x64xf32> to vector<64xf32>
    %3 = vector.shape_cast %2 : vector<64xf32> to vector<64x1xf32>
    %cst_2 = arith.constant 6.400000e+01 : f32
    %4 = vector.broadcast %cst_2 : f32 to vector<64x1xf32>
    %5 = arith.divf %3, %4 : vector<64x1xf32>
    %6 = vector.broadcast %5 : vector<64x1xf32> to vector<64x64xf32>
    %7 = arith.subf %1, %6 : vector<64x64xf32>
    %8 = arith.mulf %7, %7 : vector<64x64xf32>
    %cst_3 = arith.constant dense<0.000000e+00> : vector<64xf32>
    %9 = vector.multi_reduction <add>, %8, %cst_3 [1] : vector<64x64xf32> to vector<64xf32>
    %10 = vector.shape_cast %9 : vector<64xf32> to vector<64x1xf32>
    %cst_4 = arith.constant 6.400000e+01 : f32
    %11 = vector.broadcast %cst_4 : f32 to vector<64x1xf32>
    %12 = arith.divf %10, %11 : vector<64x1xf32>
    %cst_5 = arith.constant 9.99999974E-6 : f32
    %13 = vector.broadcast %cst_5 : f32 to vector<64x1xf32>
    %14 = arith.addf %12, %13 : vector<64x1xf32>
    %15 = math.rsqrt %14 : vector<64x1xf32>
    %16 = vector.broadcast %15 : vector<64x1xf32> to vector<64x64xf32>
    %17 = arith.mulf %7, %16 : vector<64x64xf32>
    %c0_6 = arith.constant 0 : index
    %c0_7 = arith.constant 0 : index
    %18 = vector.load %arg3[%c0_6, %c0_7] : memref<1x64xf32, #tpu.memory_space<vmem>>, vector<1x64xf32>
    %19 = vector.broadcast %18 : vector<1x64xf32> to vector<64x64xf32>
    %20 = arith.mulf %17, %19 : vector<64x64xf32>
    %c0_8 = arith.constant 0 : index
    %c0_9 = arith.constant 0 : index
    %21 = vector.load %arg4[%c0_8, %c0_9] : memref<1x64xf32, #tpu.memory_space<vmem>>, vector<1x64xf32>
    %22 = vector.broadcast %21 : vector<1x64xf32> to vector<64x64xf32>
    %23 = arith.addf %20, %22 : vector<64x64xf32>
    %24 = arith.truncf %23 : vector<64x64xf32> to vector<64x64xbf16>
    %c0_10 = arith.constant 0 : index
    %c0_11 = arith.constant 0 : index
    %25 = vector.load %arg5[%c0_10, %c0_11] : memref<64x128xbf16, #tpu.memory_space<vmem>>, vector<64x128xbf16>
    %cst_12 = arith.constant dense<0.000000e+00> : vector<64x128xf32>
    %26 = tpu.matmul %24, %25, %cst_12 {dimension_numbers = #tpu.dot_dimension_numbers<[1], [0], [0], [1], [0, 0, 1, 1], [], []>} : vector<64x64xbf16>, vector<64x128xbf16>, vector<64x128xf32> -> vector<64x128xf32>
    %c0_13 = arith.constant 0 : index
    %c0_14 = arith.constant 0 : index
    %27 = vector.load %arg6[%c0_13, %c0_14] : memref<1x128xf32, #tpu.memory_space<vmem>>, vector<1x128xf32>
    %28 = vector.broadcast %27 : vector<1x128xf32> to vector<64x128xf32>
    %29 = arith.addf %26, %28 : vector<64x128xf32>
    %30 = vector.shape_cast %29 : vector<64x128xf32> to vector<8x8x128xf32>
    %31 = vector.extract_strided_slice %30 {offsets = [0, 0, 0], sizes = [8, 8, 32], strides = [1, 1, 1]} : vector<8x8x128xf32> to vector<8x8x32xf32>
    %32 = vector.extract_strided_slice %30 {offsets = [0, 0, 64], sizes = [8, 8, 32], strides = [1, 1, 1]} : vector<8x8x128xf32> to vector<8x8x32xf32>
    %33 = tpu.concatenate %31, %32 in 1 : vector<8x8x32xf32>, vector<8x8x32xf32> -> vector<8x16x32xf32>
    %34 = vector.extract_strided_slice %30 {offsets = [0, 0, 32], sizes = [8, 8, 32], strides = [1, 1, 1]} : vector<8x8x128xf32> to vector<8x8x32xf32>
    %35 = vector.extract_strided_slice %30 {offsets = [0, 0, 96], sizes = [8, 8, 32], strides = [1, 1, 1]} : vector<8x8x128xf32> to vector<8x8x32xf32>
    %36 = tpu.concatenate %34, %35 in 1 : vector<8x8x32xf32>, vector<8x8x32xf32> -> vector<8x16x32xf32>
    %c0_15 = arith.constant 0 : index
    %c0_16 = arith.constant 0 : index
    %c0_17 = arith.constant 0 : index
    %c0_18 = arith.constant 0 : index
    %c0_19 = arith.constant 0 : index
    %37 = vector.load %arg7[%c0_15, %c0_16, %c0_17, %c0_18, %c0_19] : memref<1x2x8x16x32xf32, #tpu.memory_space<vmem>>, vector<1x1x8x16x32xf32>
    %38 = vector.shape_cast %37 : vector<1x1x8x16x32xf32> to vector<8x16x32xf32>
    %39 = vector.shape_cast %33 : vector<8x16x32xf32> to vector<1x1x8x16x32xf32>
    tpu.vector_store %arg7[%c0_15, %c0_16, %c0_17, %c0_18, %c0_19], %39 {strides = array<i32>} : memref<1x2x8x16x32xf32, #tpu.memory_space<vmem>>, vector<1x1x8x16x32xf32>,
    %c0_20 = arith.constant 0 : index
    %c1 = arith.constant 1 : index
    %c0_21 = arith.constant 0 : index
    %c0_22 = arith.constant 0 : index
    %c0_23 = arith.constant 0 : index
    %40 = vector.load %arg7[%c0_20, %c1, %c0_21, %c0_22, %c0_23] : memref<1x2x8x16x32xf32, #tpu.memory_space<vmem>>, vector<1x1x8x16x32xf32>
    %41 = vector.shape_cast %40 : vector<1x1x8x16x32xf32> to vector<8x16x32xf32>
    %42 = vector.shape_cast %36 : vector<8x16x32xf32> to vector<1x1x8x16x32xf32>
    tpu.vector_store %arg7[%c0_20, %c1, %c0_21, %c0_22, %c0_23], %42 {strides = array<i32>} : memref<1x2x8x16x32xf32, #tpu.memory_space<vmem>>, vector<1x1x8x16x32xf32>,
    return
  }
  func.func @transform_0(%arg0: i32, %arg1: i32) -> (i32, i32, i32) {
    %c0_i32 = arith.constant 0 : i32
    %c0_i32_0 = arith.constant 0 : i32
    return %arg0, %arg1, %c0_i32 : i32, i32, i32
  }
  func.func @transform_1(%arg0: i32, %arg1: i32) -> (i32, i32) {
    %c0_i32 = arith.constant 0 : i32
    %c0_i32_0 = arith.constant 0 : i32
    %c0_i32_1 = arith.constant 0 : i32
    return %c0_i32, %c0_i32_0 : i32, i32
  }
  func.func @transform_2(%arg0: i32, %arg1: i32) -> (i32, i32) {
    %c0_i32 = arith.constant 0 : i32
    %c0_i32_0 = arith.constant 0 : i32
    %c0_i32_1 = arith.constant 0 : i32
    return %c0_i32, %c0_i32_0 : i32, i32
  }
  func.func @transform_3(%arg0: i32, %arg1: i32) -> (i32, i32) {
    %c0_i32 = arith.constant 0 : i32
    %c0_i32_0 = arith.constant 0 : i32
    %c0_i32_1 = arith.constant 0 : i32
    return %c0_i32, %c0_i32_0 : i32, i32
  }
  func.func @transform_4(%arg0: i32, %arg1: i32) -> (i32, i32) {
    %c0_i32 = arith.constant 0 : i32
    %c0_i32_0 = arith.constant 0 : i32
    %c0_i32_1 = arith.constant 0 : i32
    return %c0_i32, %c0_i32_0 : i32, i32
  }
  func.func @transform_5(%arg0: i32, %arg1: i32) -> (i32, i32, i32, i32, i32) {
    %c0_i32 = arith.constant 0 : i32
    %c0_i32_0 = arith.constant 0 : i32
    %c0_i32_1 = arith.constant 0 : i32
    %c0_i32_2 = arith.constant 0 : i32
    return %arg0, %c0_i32, %arg1, %c0_i32_0, %c0_i32_1 : i32, i32, i32, i32, i32
  }
}

</mosaic_0001>

<bundles_post_ra>
// kernel: tpu_custom_call.1
= control target key start
LH: loop header
LB: loop body
LE: loop exit
PB: predicated region body
PF: predicated region fallthrough
CT: control target
= control target key end

     0   :  { %10 = vsyncpa [#allocation3], 0  ;;  %s1509_s0 = inlined_call_operand.hbm [shape: f32[2,64,64], index: 0, kind: input, shape index: {}]   ;;  %s1510_s1 = inlined_call_operand.vmem [shape: f32[1,64], index: 1, kind: input, shape index: {}]   ;;  %s1511_s2 = inlined_call_operand.vmem [shape: f32[1,64], index: 2, kind: input, shape index: {}]   ;;  %s1512_s3 = inlined_call_operand.hbm [shape: bf16[64,128], index: 3, kind: input, shape index: {}]   ;;  %s1513_s4 = inlined_call_operand.vmem [shape: f32[1,128], index: 4, kind: input, shape index: {}]   ;;  %s1514_s5 = inlined_call_operand.hbm [shape: f32[2,2,8,16,32], index: 5, kind: output, shape index: {}]  }
   0x1   :  { %12 = vsyncpa [#allocation3 + $0x1], 0 }
   0x2   :  { %13 = vsyncpa [#allocation6], 0 }
   0x3   :  { %14 = vsyncpa [#allocation4], 0 }
   0x4   :  { %16 = vsyncpa [#allocation4 + $0x1], 0  ;;  %s1137_s18 = smov 0   ;;  %s1139_s19 = smov 0  }
   0x5   :  { %s1141_s20 = smov 0   ;;  %s1143_s21 = smov 0  }
   0x6   :  { %s1145_s22 = smov 0   ;;  %s1147_s23 = smov 0  }
   0x7 LB: > { %s771_s24 = sadd.s32 4294967295, %s1094_s23   ;;  %s772_s25 = sadd.s32 4294967294, %s1094_s23   ;;  %s1094_s23 = sphi %s1147_s23, %s22_s23   ;;  %s1090_s22 = sphi %s1145_s22, %s1538_s22   ;;  %s1086_s21 = sphi %s1143_s21, %s1537_s21   ;;  %s1082_s20 = sphi %s1141_s20, %s1536_s20   ;;  %s1078_s19 = sphi %s1139_s19, %s1535_s19   ;;  %s1074_s18 = sphi %s1137_s18, %s1534_s18  }
   0x8   : > { %p56_p0 = scmp.ne.s32.totalorder %s1078_s19, %s1074_s18  ;;  %p1171_p1 = scmp.eq.s32.totalorder %s771_s24, 0 }
   0x9   : > { %p1175_p2 = scmp.eq.s32.totalorder %s771_s24, 1  ;;  %p172_p3 = scmp.eq.s32.totalorder %s772_s25, 1 }
   0xa   : > { %s1519_s26 = scalar_select %p1171_p1, 1, 0 }
   0xb   : > { %s1520_s27 = scalar_select %p1175_p2, 1, 0 }
   0xc   : > { %p1181_p4 = por %p1171_p1, %p56_p0  ;;  %p773_p5 = scmp.ge.s32.totalorder %s1094_s23, 1 }
   0xd   : > { %p1186_p6 = por %p172_p3, %p56_p0  ;;  %p179_p7 = scmp.lt.s32.totalorder %s1094_s23, 3 }
   0xe   : > { %s1521_s28 = scalar_select %p1181_p4, 1, 0 }
   0xf   : > { %s1522_s29 = scalar_select %p1186_p6, 1, 0 }
  0x10   : > { %p1191_p8 = pnand %p773_p5, %p179_p7  ;;  %s1096_s6 = smov [#allocation5]  }
  0x11   : > { %s197_s7 = sshll.u32 %s1096_s6, 4  ;;  %s34_s9 = sadd.s32 1, %s1090_s22  ;;  %s198_s7 = int_to_ptr.vmem [resolvable:$true] %s197_s7 }
  0x12   : > { %s1523_s30 = scalar_select %p1191_p8, 1, 0 }
  0x13   : > { %p857_p9 = pneg %p1191_p8  ;;  %s950_s12 = scalar_lea.hbm %s1512_s3, 512 }
  0x14   : > { %p951_p12 = scmp.ne.s32.totalorder %s1512_s3, %s950_s12  ;;  %p957_p5 = scmp.lt.u32.totalorder %s950_s12, %s1512_s3 }
  0x15   : > { %p1200_p11 = pnand %p857_p9, %p1171_p1 }
  0x17   : > { %p952_p13 = pneg %p1200_p11 }
  0x19   : > { %p953_p0 = pnand %p952_p13, %p951_p12 }
  0x1b   : > { %p954_p3 = pneg %p953_p0 }
  0x1d   : > { %p959_p7 = pnand %p957_p5, %p954_p3 }
  0x1f   : > { %962 = shalt.err (!%p959_p7)
}
  0x20   : > { %s963_s17 = scalar_lea.vmem %s198_s7, 512  ;;  %p971_p1 = scmp.lt.s32.totalorder %s198_s7, %s198_s7 }
  0x21   : > { %p964_p9 = scmp.ne.s32.totalorder %s198_s7, %s963_s17  ;;  %p972_p4 = scmp.lt.s32.totalorder %s963_s17, %s963_s17 }
  0x23   : > { %p966_p10 = pnand %p964_p9, %p952_p13  ;;  %p973_p8 = por %p972_p4, %p971_p1 }
  0x25   : > { %p967_p6 = pneg %p966_p10 }
  0x27   : > { %p974_p2 = pnand %p973_p8, %p967_p6 }
  0x29   : > { %977 = shalt.err (!%p974_p2)
}
  0x2a   : > { %s1097_s24 = smov 64   ;;  %s1098_s25 = smov 4  }
  0x2b   : > { %860 = dma.hbm_to_vmem [thread:$0]  (!%p1200_p11), %s1512_s3, 512, %s198_s7, [#allocation6], %s1097_s24, %s1097_s24, %s1098_s25  }
  0x2c   : > { %p36_p1 = scmp.ge.s32.totalorder %s34_s9, 2  ;;  %s43_s11 = sadd.s32 1, %s1082_s20 }
  0x2d   : > { %p50_p2 = scmp.ne.s32.totalorder %s1082_s20, %s1078_s19  ;;  %p51_p4 = scmp.eq.s32.totalorder %s1094_s23, 0 }
  0x2e   : > { %s1540_s9 = smov (%p36_p1, %s34_s9), 0  ;;  %p1526_p8 = scmp.ne.s32.totalorder %s1520_s27, 0 }
  0x2f   : > { %p1227_p6 = por %p51_p4, %p50_p2  ;;  %s38_s8 = ssub.s32 %s1090_s22, %s1540_s9 }
  0x30   : > { %p1233_p10 = por %p1526_p8, %p50_p2  ;;  %p870_p12 = scmp.lt.s32.totalorder %s1094_s23, 2 }
  0x31   : > { %p41_p11 = scmp.eq.s32.totalorder %s38_s8, 0  ;;  %s214_s7 = sand.u32 1, %s1082_s20  }
  0x32   : > { %s776_s14 = sshll.u32 %s214_s7, 6  ;;  %s815_s16 = sshll.u32 %s1090_s22, 10 }
  0x33   : > { %s1242_s15 = scalar_select %p41_p11, %s1082_s20, %s43_s11  }
  0x34   : > { %s1248_s25 = scalar_lea.hbm %s1509_s0, %s815_s16  ;;  %s218_s27 = scalar_lea.vmem [#allocation2], %s776_s14 }
  0x35   : > { %s227_s6 = sshll.u32 %s218_s27, 4  ;;  %p1254_p13 = pnand %p870_p12, %p1227_p6  ;;  %s1250_s6 = int_to_ptr.vmem [resolvable:$true] %s227_s6 }
  0x36   : > { %s1258_s11 = scalar_lea.sflag [#allocation3], %s214_s7  ;;  %s978_s8 = scalar_lea.hbm %s1248_s25, 1024 }
  0x37   : > { %p979_p0 = scmp.ne.s32.totalorder %s1248_s25, %s978_s8  ;;  %p980_p3 = pneg %p1254_p13 }
  0x38   : > { %s983_s12 = scalar_lea.hbm %s1509_s0, 2048  ;;  %p984_p9 = scmp.lt.u32.totalorder %s1248_s25, %s1509_s0 }
  0x39   : > { %p981_p5 = pnand %p980_p3, %p979_p0  ;;  %p985_p1 = scmp.lt.u32.totalorder %s983_s12, %s978_s8 }
  0x3a   : > { %p987_p4 = scmp.lt.u32.totalorder %s978_s8, %s1248_s25 }
  0x3b   : > { %p982_p7 = pneg %p981_p5  ;;  %p986_p2 = por %p985_p1, %p984_p9 }
  0x3d   : > { %p988_p6 = por %p987_p4, %p986_p2 }
  0x3f   : > { %p989_p8 = pnand %p988_p6, %p982_p7 }
  0x41   : > { %992 = shalt.err (!%p989_p8)
}
  0x42   : > { %s993_s7 = scalar_lea.vmem %s1250_s6, 1024  ;;  %s1099_s27 = smov [#allocation2]  }
  0x43   : > { %p994_p12 = scmp.ne.s32.totalorder %s1250_s6, %s993_s7  ;;  %s998_s14 = sshll.u32 %s1099_s27, 4  ;;  %s999_s14 = int_to_ptr.vmem [resolvable:$false] %s998_s14 }
  0x44   : > { %s1000_s16 = scalar_lea.vmem %s999_s14, 2048  ;;  %p1001_p5 = scmp.lt.s32.totalorder %s1250_s6, %s999_s14 }
  0x45   : > { %p996_p11 = pnand %p994_p12, %p980_p3  ;;  %p1002_p9 = scmp.lt.s32.totalorder %s1000_s16, %s993_s7 }
  0x47   : > { %p997_p0 = pneg %p996_p11  ;;  %p1003_p1 = por %p1002_p9, %p1001_p5 }
  0x49   : > { %p1004_p2 = pnand %p1003_p1, %p997_p0 }
  0x4b   : > { %1007 = shalt.err (!%p1004_p2)
}
  0x4c   : > { %s1100_s8 = smov 128   ;;  %s1101_s12 = smov 8  }
  0x4d   : > { %864 = dma.hbm_to_vmem [thread:$0]  (!%p1254_p13), %s1248_s25, 1024, %s1250_s6, %s1258_s11, %s1100_s8, %s1100_s8, %s1101_s12  }
  0x4e   : > { %p1529_p3 = scmp.ne.s32.totalorder %s1523_s30, 0 }
  0x4f   : > { %s1289_s17 = sand.u32 (!%p1529_p3), 1, %s1078_s19   ;;  %p1530_p7 = scmp.ne.s32.totalorder (!%p1529_p3), %s1521_s28, 0 }
  0x50   : > { %239 = sbr.rel (%p1529_p3) target bundleno = 911 (0x38f), region = 40  ;;  %s780_s24 = sshll.u32 (!%p1529_p3), %s1289_s17, 6 }
  0x51   : > { %s242_s7 = scalar_lea.sflag (!%p1529_p3), [#allocation3], %s1289_s17  ;;  %s245_s27 = scalar_lea.vmem (!%p1529_p3), [#allocation2], %s780_s24 }
  0x57   : > { %1061 = dma.done.wait (%p1530_p7), %s242_s7, 1024  }
  0x58   : > { %1063 = vsyncadd (%p1530_p7), %s242_s7, 4294966272  ;;  %p1531_p4 = scmp.ne.s32.totalorder %s1519_s26, 0 }
  0x5a   : > { %1065 = dma.done.wait (%p1531_p4), [#allocation6], 512  }
  0x5b   : > { %1067 = vsyncadd (%p1531_p4), [#allocation6], 4294966784  ;;  %vm287_vm0 = vcmask 523264   ;;  %v279_v0 = vld [vmem:[%s245_s27] sm:$0xff]  ;;  %v280_v2 = vld [vmem:[%s245_s27 + $0x8] sm:$0xff]  ;;  %s782_s6 = sshll.u32 %s1289_s17, 8 }
  0x5c   : > { %v283_v1 = vld [vmem:[%s245_s27 + $0x20] sm:$0xff]  ;;  %v288_v3 = vsel %vm287_vm0, %v279_v0, 0.0  ;;  %v284_v5 = vld [vmem:[%s245_s27 + $0x28] sm:$0xff]  ;;  %v291_v6 = vsel %vm287_vm0, %v280_v2, 0.0  ;;  %v281_v7 = vld [vmem:[%s245_s27 + $0x10] sm:$0xff]  ;;  %vm575_vm1 = vcmask 261120  }
  0x5d   : > { %v300_v4 = vsel %vm287_vm0, %v283_v1, 0.0  ;;  %289 = vadd.xlane.f32.xlu0 %v288_v3  ;;  %v303_v8 = vsel %vm287_vm0, %v284_v5, 0.0  ;;  %v282_v9 = vld [vmem:[%s245_s27 + $0x18] sm:$0xff]  ;;  %v294_v10 = vsel %vm287_vm0, %v281_v7, 0.0  ;;  %v285_v12 = vld [vmem:[%s245_s27 + $0x30] sm:$0xff]  ;;  %v930_v56 = vld [vmem:[#allocation5] sm:$0xff]  }
  0x5e   : > { %301 = vadd.xlane.f32.xlu1 %v300_v4  ;;  %v297_v11 = vsel %vm287_vm0, %v282_v9, 0.0  ;;  %v286_v13 = vld [vmem:[%s245_s27 + $0x38] sm:$0xff]  ;;  %v306_v14 = vsel %vm287_vm0, %v285_v12, 0.0  ;;  %825 = vmatprep.subr.bf16.mxu0 %v930_v56  ;;  %v931_v57 = vld [vmem:[#allocation5 + $0x8] sm:$0xff]   ;;  %v932_v58 = vld [vmem:[#allocation5 + $0x10] sm:$0xff]   ;;  %s1371_s14 = scalar_lea.vmem [#allocation7], %s782_s6 }
  0x5f   : > { %v309_v15 = vsel %vm287_vm0, %v286_v13, 0.0  ;;  %841 = vmatprep.subr.bf16.mxu1 %v930_v56  ;;  %826 = vmatpush3.bf16.msra.mxu0 %v930_v56  ;;  %v933_v59 = vld [vmem:[#allocation5 + $0x18] sm:$0xff]   ;;  %s1102_s16 = smov 64   ;;  %s1103_s8 = smov 96  }
  0x60   : > { %845 = vmatpush3.bf16.msra.mxu1 %v930_v56  ;;  %827 = vmatprep.subr.bf16.mxu0 %v931_v57  ;;  %s816_s12 = sshll.u32 %s1086_s21, 12  ;;  %s674_s24 = sshll.u32 %s1371_s14, 4  ;;  %s1458_s24 = int_to_ptr.vmem [resolvable:$true] %s674_s24 }
  0x61   : > { %292 = vadd.xlane.f32.xlu0 %v291_v6  ;;  %842 = vmatprep.subr.bf16.mxu1 %v931_v57  ;;  %s1456_s26 = scalar_lea.hbm %s1514_s5, %s816_s12  ;;  %s658_s28 = scalar_lea.sflag [#allocation4], %s1289_s17 }
  0x62   : > { %304 = vadd.xlane.f32.xlu1 %v303_v8  ;;  %s1008_s30 = scalar_lea.vmem %s1458_s24, 4096  ;;  %s1104_s21 = smov [#allocation7]  }
  0x63   : > { %828 = vmatpush3.bf16.msra.mxu0 %v931_v57  ;;  %p1009_p13 = scmp.ne.s32.totalorder %s1458_s24, %s1008_s30  ;;  %s1012_s25 = sshll.u32 %s1104_s21, 4  ;;  %s1013_s25 = int_to_ptr.vmem [resolvable:$false] %s1012_s25 }
  0x64   : > { %846 = vmatpush3.bf16.msra.mxu1 %v931_v57  ;;  %829 = vmatprep.subr.bf16.mxu0 %v932_v58  ;;  %s1014_s6 = scalar_lea.vmem %s1013_s25, 8192  ;;  %p1015_p12 = scmp.lt.s32.totalorder %s1458_s24, %s1013_s25 }
  0x65   : > { %295 = vadd.xlane.f32.xlu0 %v294_v10  ;;  %843 = vmatprep.subr.bf16.mxu1 %v932_v58  ;;  %p1010_p6 = pnand %p1009_p13, %p1233_p10  ;;  %p1016_p11 = scmp.lt.s32.totalorder %s1014_s6, %s1008_s30 }
  0x66   : > { %298 = vadd.xlane.f32.xlu1 %v297_v11 }
  0x67   : > { %830 = vmatpush3.bf16.msra.mxu0 %v932_v58  ;;  %p1011_p8 = pneg %p1010_p6  ;;  %p1017_p0 = por %p1016_p11, %p1015_p12 }
  0x68   : > { %847 = vmatpush3.bf16.msra.mxu1 %v932_v58  ;;  %831 = vmatprep.subr.bf16.mxu0 %v933_v59 }
  0x69   : > { %307 = vadd.xlane.f32.xlu0 %v306_v14  ;;  %844 = vmatprep.subr.bf16.mxu1 %v933_v59  ;;  %p1018_p5 = pnand %p1017_p0, %p1011_p8 }
  0x6a   : > { %310 = vadd.xlane.f32.xlu1 %v309_v15 }
  0x6b   : > { %832 = vmatpush3.bf16.msra.mxu0 %v933_v59 }
  0x6c   : > { %848 = vmatpush3.bf16.msra.mxu1 %v933_v59 }
  0xea   : > { %v290_v16 = vpop.xlane.xlu0 %289 }
  0xeb   : > { %v302_v17 = vpop.xlane.xlu1 %301  ;;  %v313_v18 = vmul.f32 0.015625, %v290_v16 }
  0xec   : > { %v317_v19 = vmul.f32 0.015625, %v302_v17 }
  0xed   : > { %v1309_v20 = vsub.f32 %v279_v0, %v313_v18 }
  0xee   : > { %v1311_v21 = vsub.f32 %v283_v1, %v317_v19  ;;  %v293_v22 = vpop.xlane.xlu0 %292 }
  0xef   : > { %v305_v23 = vpop.xlane.xlu1 %304  ;;  %v314_v24 = vmul.f32 0.015625, %v293_v22  ;;  %v329_v26 = vmul.f32 %v1309_v20, %v1309_v20 }
  0xf0   : > { %v318_v25 = vmul.f32 0.015625, %v305_v23  ;;  %v333_v27 = vmul.f32 %v1311_v21, %v1311_v21  ;;  %v783_v23 = vld [vmem:[%s1510_s1] ss:$0 sm:$0xff] }
  0xf1   : > { %v1317_v28 = vsub.f32 %v280_v2, %v314_v24  ;;  %v337_v30 = vsel %vm287_vm0, %v329_v26, 0.0 }
  0xf2   : > { %v1319_v29 = vsub.f32 %v284_v5, %v318_v25  ;;  %338 = vadd.xlane.f32.xlu0 %v337_v30  ;;  %v296_v31 = vpop.xlane.xlu0 %295  ;;  %v349_v33 = vsel %vm287_vm0, %v333_v27, 0.0 }
  0xf3   : > { %v299_v32 = vpop.xlane.xlu1 %298  ;;  %v315_v34 = vmul.f32 0.015625, %v296_v31  ;;  %v330_v36 = vmul.f32 %v1317_v28, %v1317_v28  ;;  %v784_v31 = vld [vmem:[%s1511_s2] ss:$0 sm:$0xff] }
  0xf4   : > { %v316_v35 = vmul.f32 0.015625, %v299_v32  ;;  %v334_v37 = vmul.f32 %v1319_v29, %v1319_v29 }
  0xf5   : > { %v1327_v38 = vsub.f32 %v281_v7, %v315_v34  ;;  %v340_v40 = vsel %vm287_vm0, %v330_v36, 0.0 }
  0xf6   : > { %v1329_v39 = vsub.f32 %v282_v9, %v316_v35  ;;  %350 = vadd.xlane.f32.xlu0 %v349_v33  ;;  %341 = vadd.xlane.f32.xlu1 %v340_v40  ;;  %v308_v41 = vpop.xlane.xlu0 %307  ;;  %v352_v43 = vsel %vm287_vm0, %v334_v37, 0.0 }
  0xf7   : > { %v311_v42 = vpop.xlane.xlu1 %310  ;;  %v319_v44 = vmul.f32 0.015625, %v308_v41  ;;  %v331_v46 = vmul.f32 %v1327_v38, %v1327_v38 }
  0xf8   : > { %v320_v45 = vmul.f32 0.015625, %v311_v42  ;;  %v332_v47 = vmul.f32 %v1329_v39, %v1329_v39 }
  0xf9   : > { %v1337_v48 = vsub.f32 %v285_v12, %v319_v44  ;;  %v343_v50 = vsel %vm287_vm0, %v331_v46, 0.0 }
  0xfa   : > { %v1339_v49 = vsub.f32 %v286_v13, %v320_v45  ;;  %353 = vadd.xlane.f32.xlu1 %v352_v43  ;;  %344 = vadd.xlane.f32.xlu0 %v343_v50  ;;  %v346_v51 = vsel %vm287_vm0, %v332_v47, 0.0 }
  0xfb   : > { %v335_v52 = vmul.f32 %v1337_v48, %v1337_v48 }
  0xfc   : > { %v336_v53 = vmul.f32 %v1339_v49, %v1339_v49 }
  0xfd   : > { %v355_v54 = vsel %vm287_vm0, %v335_v52, 0.0 }
  0xfe   : > { %347 = vadd.xlane.f32.xlu1 %v346_v51  ;;  %356 = vadd.xlane.f32.xlu0 %v355_v54  ;;  %v358_v55 = vsel %vm287_vm0, %v336_v53, 0.0 }
 0x102   : > { %359 = vadd.xlane.f32.xlu1 %v358_v55 }
 0x17f   : > { %v339_v60 = vpop.xlane.xlu0 %338 }
 0x180   : > { %v361_v61 = vmul.f32 0.015625, %v339_v60 }
 0x182   : > { %v369_v62 = vadd.f32 1e-05, %v361_v61 }
 0x183   : > { %v342_v63 = vpop.xlane.xlu1 %341  ;;  %v351_v0 = vpop.xlane.xlu0 %350 }
 0x184   : > { %934 = vrsqrt.f32 %v369_v62  ;;  %v362_v1 = vmul.f32 0.015625, %v342_v63  ;;  %v365_v2 = vmul.f32 0.015625, %v351_v0 }
 0x186   : > { %v370_v3 = vadd.f32 1e-05, %v362_v1  ;;  %v373_v4 = vadd.f32 1e-05, %v365_v2 }
 0x187   : > { %v354_v5 = vpop.xlane.xlu1 %353  ;;  %v345_v6 = vpop.xlane.xlu0 %344 }
 0x188   : > { %936 = vrsqrt.f32 %v370_v3  ;;  %v366_v7 = vmul.f32 0.015625, %v354_v5  ;;  %v363_v8 = vmul.f32 0.015625, %v345_v6 }
 0x189   : > { %938 = vrsqrt.f32 %v373_v4 }
 0x18a   : > { %v374_v9 = vadd.f32 1e-05, %v366_v7  ;;  %v371_v10 = vadd.f32 1e-05, %v363_v8 }
 0x18b   : > { %v348_v11 = vpop.xlane.xlu1 %347  ;;  %v357_v12 = vpop.xlane.xlu0 %356 }
 0x18c   : > { %940 = vrsqrt.f32 %v374_v9  ;;  %v364_v13 = vmul.f32 0.015625, %v348_v11  ;;  %v367_v14 = vmul.f32 0.015625, %v357_v12 }
 0x18d   : > { %942 = vrsqrt.f32 %v371_v10 }
 0x18e   : > { %v935_v15 = vpop.eup %934  ;;  %v372_v16 = vadd.f32 1e-05, %v364_v13  ;;  %v375_v17 = vadd.f32 1e-05, %v367_v14 }
 0x18f   : > { %v360_v18 = vpop.xlane.xlu1 %359  ;;  %v385_v19 = vmul.f32 %v935_v15, %v1309_v20 }
 0x190   : > { %944 = vrsqrt.f32 %v372_v16  ;;  %v368_v22 = vmul.f32 0.015625, %v360_v18 }
 0x191   : > { %946 = vrsqrt.f32 %v375_v17  ;;  %v400_v30 = vmul.f32 %v783_v23, %v385_v19 }
 0x192   : > { %v937_v24 = vpop.eup %936  ;;  %v376_v25 = vadd.f32 1e-05, %v368_v22 }
 0x193   : > { %v939_v26 = vpop.eup %938  ;;  %v386_v27 = vmul.f32 %v937_v24, %v1317_v28  ;;  %v415_v35 = vadd.f32 %v784_v31, %v400_v30 }
 0x194   : > { %948 = vrsqrt.f32 %v376_v25  ;;  %v389_v20 = vmul.f32 %v939_v26, %v1311_v21 }
 0x195   : > { %v401_v32 = vmul.f32 %v783_v23, %v386_v27 }
 0x196   : > { %v941_v33 = vpop.eup %940  ;;  %v404_v40 = vmul.f32 %v783_v23, %v389_v20 }
 0x197   : > { %v943_v34 = vpop.eup %942  ;;  %v416_v36 = vadd.f32 %v784_v31, %v401_v32  ;;  %v390_v37 = vmul.f32 %v941_v33, %v1319_v29 }
 0x198   : > { %v387_v41 = vmul.f32 %v943_v34, %v1327_v38  ;;  %v419_v46 = vadd.f32 %v784_v31, %v404_v40 }
 0x199   : > { %v423_v42 = vpack.c.bf16 %v416_v36, %v415_v35  ;;  %v405_v28 = vmul.f32 %v783_v23, %v390_v37 }
 0x19a   : > { %v945_v43 = vpop.eup %944  ;;  %v402_v47 = vmul.f32 %v783_v23, %v387_v41 }
 0x19b   : > { %v947_v44 = vpop.eup %946  ;;  %v388_v45 = vmul.f32 %v945_v43, %v1329_v39  ;;  %833 = vmatprep.mubr.msk.bf16.mxu0 %vm287_vm0, %v423_v42  ;;  %v420_v21 = vadd.f32 %v784_v31, %v405_v28 }
 0x19c   : > { %v391_v50 = vmul.f32 %v947_v44, %v1337_v48  ;;  %v417_v38 = vadd.f32 %v784_v31, %v402_v47  ;;  %v785_v48 = vld [vmem:[%s1513_s4] ss:$0 sm:$0xff] }
 0x19d   : > { %v425_v51 = vpack.c.bf16 %v420_v21, %v419_v46  ;;  %v403_v52 = vmul.f32 %v783_v23, %v388_v45 }
 0x19e   : > { %v949_v29 = vpop.eup %948  ;;  %v406_v55 = vmul.f32 %v783_v23, %v391_v50 }
 0x19f   : > { %v392_v53 = vmul.f32 %v949_v29, %v1339_v49  ;;  %837 = vmatprep.mubr.msk.bf16.mxu1 %vm287_vm0, %v425_v51  ;;  %v418_v54 = vadd.f32 %v784_v31, %v403_v52 }
 0x1a0   : > { %v421_v57 = vadd.f32 %v784_v31, %v406_v55 }
 0x1a1   : > { %v424_v56 = vpack.c.bf16 %v418_v54, %v417_v38  ;;  %v407_v39 = vmul.f32 %v783_v23, %v392_v53 }
 0x1a3   : > { %834 = vmatmul.mubr.msk.bf16.vlgmr.msra.gmra.mrb[0].mxu0 %vm287_vm0, %v424_v56  ;;  %v422_v58 = vadd.f32 %v784_v31, %v407_v39 }
 0x1a5   : > { %v426_v59 = vpack.c.bf16 %v422_v58, %v421_v57 }
 0x1a7   : > { %838 = vmatmul.mubr.msk.bf16.vlgmr.msra.gmra.mrb[0].mxu1 %vm287_vm0, %v426_v59 }
 0x276   : > { %v835_v49 = vpop.f32.mrb[0].mxu0 }
 0x277   : > { %v521_v60 = vadd.f32 %v835_v49, %v785_v48  ;;  %v512_v61 = vpop.f32.mrb[1].mxu0 }
 0x278   : > { %v513_v62 = vadd.f32 %v785_v48, %v512_v61  ;;  %v836_v63 = vpop.f32.mrb[2].mxu0 }
 0x279   : > { %580 = vst.msk [vmem:[%s1371_s14 + $0x20] sm:$0xff] %vm575_vm1, %v521_v60  ;;  %v524_v0 = vadd.f32 %v836_v63, %v785_v48  ;;  %555 = vrot.lane.b32.xlu1 %v521_v60, %s1102_s16  ;;  %v515_v1 = vpop.f32.mrb[3].mxu0 }
 0x27a   : > { %576 = vst.msk [vmem:[%s1371_s14] sm:$0xff] %vm575_vm1, %v513_v62  ;;  %v516_v2 = vadd.f32 %v785_v48, %v515_v1  ;;  %551 = vrot.lane.b32.xlu0 %v513_v62, %s1102_s16  ;;  %v839_v3 = vpop.f32.mrb[0].mxu1 }
 0x27b   : > { %582 = vst.msk [vmem:[%s1371_s14 + $0x30] sm:$0xff] %vm575_vm1, %v524_v0  ;;  %v537_v4 = vadd.f32 %v839_v3, %v785_v48  ;;  %v528_v5 = vpop.f32.mrb[1].mxu1 }
 0x27c   : > { %578 = vst.msk [vmem:[%s1371_s14 + $0x10] sm:$0xff] %vm575_vm1, %v516_v2  ;;  %v529_v6 = vadd.f32 %v785_v48, %v528_v5  ;;  %v840_v7 = vpop.f32.mrb[2].mxu1 }
 0x27d   : > { %588 = vst.msk [vmem:[%s1371_s14 + $0x60] sm:$0xff] %vm575_vm1, %v537_v4  ;;  %v540_v8 = vadd.f32 %v840_v7, %v785_v48  ;;  %557 = vrot.lane.b32.xlu1 %v524_v0, %s1102_s16  ;;  %v531_v9 = vpop.f32.mrb[3].mxu1 }
 0x27e   : > { %584 = vst.msk [vmem:[%s1371_s14 + $0x40] sm:$0xff] %vm575_vm1, %v529_v6  ;;  %v532_v10 = vadd.f32 %v785_v48, %v531_v9  ;;  %559 = vrot.lane.b32.xlu0 %v529_v6, %s1102_s16 }
 0x27f   : > { %590 = vst.msk [vmem:[%s1371_s14 + $0x70] sm:$0xff] %vm575_vm1, %v540_v8 }
 0x280   : > { %586 = vst.msk [vmem:[%s1371_s14 + $0x50] sm:$0xff] %vm575_vm1, %v532_v10 }
 0x281   : > { %553 = vrot.lane.b32.xlu1 %v516_v2, %s1102_s16 }
 0x282   : > { %563 = vrot.lane.b32.xlu0 %v537_v4, %s1102_s16 }
 0x285   : > { %561 = vrot.lane.b32.xlu1 %v532_v10, %s1102_s16 }
 0x286   : > { %592 = vrot.lane.b32.xlu0 %v513_v62, %s1103_s8 }
 0x289   : > { %565 = vrot.lane.b32.xlu1 %v540_v8, %s1102_s16 }
 0x28a   : > { %600 = vrot.lane.b32.xlu0 %v521_v60, %s1103_s8 }
 0x28e   : > { %604 = vrot.lane.b32.xlu0 %v524_v0, %s1103_s8 }
 0x292   : > { %608 = vrot.lane.b32.xlu0 %v529_v6, %s1103_s8 }
 0x296   : > { %616 = vrot.lane.b32.xlu0 %v537_v4, %s1103_s8 }
 0x29a   : > { %596 = vrot.lane.b32.xlu0 %v516_v2, %s1103_s8 }
 0x29e   : > { %612 = vrot.lane.b32.xlu0 %v532_v10, %s1103_s8 }
 0x2a2   : > { %620 = vrot.lane.b32.xlu0 %v540_v8, %s1103_s8 }
 0x2eb   : > { %v556_v11 = vpop.permute.xlu1 %555 }
 0x2ec   : > { %581 = vst.msk [vmem:[%s1371_s14 + $0x28] sm:$0xff] %vm575_vm1, %v556_v11  ;;  %602 = vrot.lane.b32.xlu1 %v556_v11, %s1103_s8  ;;  %v552_v12 = vpop.permute.xlu0 %551 }
 0x2ed   : > { %577 = vst.msk [vmem:[%s1371_s14 + $0x8] sm:$0xff] %vm575_vm1, %v552_v12 }
 0x2ef   : > { %v558_v13 = vpop.permute.xlu1 %557 }
 0x2f0   : > { %583 = vst.msk [vmem:[%s1371_s14 + $0x38] sm:$0xff] %vm575_vm1, %v558_v13  ;;  %v560_v14 = vpop.permute.xlu0 %559 }
 0x2f1   : > { %585 = vst.msk [vmem:[%s1371_s14 + $0x48] sm:$0xff] %vm575_vm1, %v560_v14 }
 0x2f3   : > { %v554_v15 = vpop.permute.xlu1 %553 }
 0x2f4   : > { %579 = vst.msk [vmem:[%s1371_s14 + $0x18] sm:$0xff] %vm575_vm1, %v554_v15  ;;  %v564_v16 = vpop.permute.xlu0 %563 }
 0x2f5   : > { %589 = vst.msk [vmem:[%s1371_s14 + $0x68] sm:$0xff] %vm575_vm1, %v564_v16  ;;  %618 = vrot.lane.b32.xlu1 %v564_v16, %s1103_s8 }
 0x2f7   : > { %v562_v17 = vpop.permute.xlu1 %561 }
 0x2f8   : > { %587 = vst.msk [vmem:[%s1371_s14 + $0x58] sm:$0xff] %vm575_vm1, %v562_v17  ;;  %v593_v18 = vpop.permute.xlu0 %592 }
 0x2f9   : > { %794 = vst.msk [vmem:[%s1371_s14 + $0x80] sm:$0xff] %vm575_vm1, %v593_v18  ;;  %594 = vrot.lane.b32.xlu1 %v552_v12, %s1103_s8 }
 0x2fb   : > { %v566_v19 = vpop.permute.xlu1 %565 }
 0x2fc   : > { %591 = vst.msk [vmem:[%s1371_s14 + $0x78] sm:$0xff] %vm575_vm1, %v566_v19  ;;  %v601_v22 = vpop.permute.xlu0 %600 }
 0x2fd   : > { %798 = vst.msk [vmem:[%s1371_s14 + $0xa0] sm:$0xff] %vm575_vm1, %v601_v22  ;;  %610 = vrot.lane.b32.xlu1 %v560_v14, %s1103_s8 }
 0x300   : > { %v605_v23 = vpop.permute.xlu0 %604 }
 0x301   : > { %800 = vst.msk [vmem:[%s1371_s14 + $0xb0] sm:$0xff] %vm575_vm1, %v605_v23  ;;  %606 = vrot.lane.b32.xlu1 %v558_v13, %s1103_s8 }
 0x304   : > { %v609_v24 = vpop.permute.xlu0 %608 }
 0x305   : > { %802 = vst.msk [vmem:[%s1371_s14 + $0xc0] sm:$0xff] %vm575_vm1, %v609_v24  ;;  %598 = vrot.lane.b32.xlu1 %v554_v15, %s1103_s8 }
 0x308   : > { %v617_v25 = vpop.permute.xlu0 %616 }
 0x309   : > { %806 = vst.msk [vmem:[%s1371_s14 + $0xe0] sm:$0xff] %vm575_vm1, %v617_v25  ;;  %614 = vrot.lane.b32.xlu1 %v562_v17, %s1103_s8 }
 0x30c   : > { %v597_v26 = vpop.permute.xlu0 %596 }
 0x30d   : > { %796 = vst.msk [vmem:[%s1371_s14 + $0x90] sm:$0xff] %vm575_vm1, %v597_v26  ;;  %622 = vrot.lane.b32.xlu1 %v566_v19, %s1103_s8 }
 0x310   : > { %v613_v27 = vpop.permute.xlu0 %612 }
 0x311   : > { %804 = vst.msk [vmem:[%s1371_s14 + $0xd0] sm:$0xff] %vm575_vm1, %v613_v27 }
 0x314   : > { %v621_v30 = vpop.permute.xlu0 %620 }
 0x315   : > { %808 = vst.msk [vmem:[%s1371_s14 + $0xf0] sm:$0xff] %vm575_vm1, %v621_v30 }
 0x35e   : > { %v603_v31 = vpop.permute.xlu1 %602 }
 0x35f   : > { %799 = vst.msk [vmem:[%s1371_s14 + $0xa8] sm:$0xff] %vm575_vm1, %v603_v31 }
 0x367   : > { %v619_v20 = vpop.permute.xlu1 %618 }
 0x368   : > { %807 = vst.msk [vmem:[%s1371_s14 + $0xe8] sm:$0xff] %vm575_vm1, %v619_v20 }
 0x36b   : > { %v595_v32 = vpop.permute.xlu1 %594 }
 0x36c   : > { %795 = vst.msk [vmem:[%s1371_s14 + $0x88] sm:$0xff] %vm575_vm1, %v595_v32 }
 0x36f   : > { %v611_v33 = vpop.permute.xlu1 %610 }
 0x370   : > { %803 = vst.msk [vmem:[%s1371_s14 + $0xc8] sm:$0xff] %vm575_vm1, %v611_v33 }
 0x373   : > { %v607_v34 = vpop.permute.xlu1 %606 }
 0x374   : > { %801 = vst.msk [vmem:[%s1371_s14 + $0xb8] sm:$0xff] %vm575_vm1, %v607_v34 }
 0x377   : > { %v599_v35 = vpop.permute.xlu1 %598 }
 0x378   : > { %797 = vst.msk [vmem:[%s1371_s14 + $0x98] sm:$0xff] %vm575_vm1, %v599_v35 }
 0x37b   : > { %v615_v36 = vpop.permute.xlu1 %614 }
 0x37c   : > { %805 = vst.msk [vmem:[%s1371_s14 + $0xd8] sm:$0xff] %vm575_vm1, %v615_v36 }
 0x37f   : > { %v623_v37 = vpop.permute.xlu1 %622 }
 0x380   : > { %809 = vst.msk [vmem:[%s1371_s14 + $0xf8] sm:$0xff] %vm575_vm1, %v623_v37 }
 0x381   : > { %1021 = shalt.err (!%p1018_p5)
}
 0x382   : > { %s1022_s10 = scalar_lea.hbm %s1456_s26, 4096  ;;  %s1026_s16 = scalar_lea.hbm %s1514_s5, 8192 }
 0x383   : > { %p1023_p9 = scmp.ne.s32.totalorder %s1456_s26, %s1022_s10  ;;  %p1027_p3 = scmp.lt.u32.totalorder %s1456_s26, %s1514_s5 }
 0x384   : > { %p1028_p7 = scmp.lt.u32.totalorder %s1026_s16, %s1022_s10  ;;  %p1030_p13 = scmp.lt.u32.totalorder %s1022_s10, %s1456_s26 }
 0x385   : > { %p1024_p1 = pnand %p1023_p9, %p1233_p10 }
 0x386   : > { %p1029_p4 = por %p1028_p7, %p1027_p3 }
 0x387   : > { %p1025_p2 = pneg %p1024_p1 }
 0x388   : > { %p1031_p6 = por %p1030_p13, %p1029_p4 }
 0x38a   : > { %p1032_p8 = pnand %p1031_p6, %p1025_p2 }
 0x38c   : > { %1035 = shalt.err (!%p1032_p8)
}
 0x38d   : > { %s1105_s7 = smov 128   ;;  %s1106_s27 = smov 8  }
 0x38e   : > { %855 = dma.vmem_to_hbm [thread:$0]  (%p1233_p10), %s1458_s24, 4096, %s1456_s26, %s658_s28, %s1105_s7, %s1105_s7, %s1106_s27  }
 0x38f PF: > { %s689_s30 = sand.u32 1, %s1074_s18   ;;  %p1532_p12 = scmp.ne.s32.totalorder %s1522_s29, 0 }
 0x390   : > { %p1533_p11 = scmp.ge.s32.totalorder %s1094_s23, 2  ;;  %s690_s21 = scalar_lea.sflag [#allocation4], %s689_s30 }
 0x392   : > { %p866_p0 = pnand %p1533_p11, %p1532_p12 }
 0x394   : > { %1069 = dma.done.wait (!%p866_p0), %s690_s21, 4096  }
 0x395   : > { %1071 = vsyncadd (!%p866_p0), %s690_s21, 4294963200  ;;  %s22_s23 = sadd.s32 1, %s1094_s23   ;;  %s1534_s18 = smov %s1078_s19 }
 0x396   : > { %p19_p5 = scmp.ge.s32.totalorder %s22_s23, 4   ;;  %s1535_s19 = smov %s1082_s20 }
 0x397   : > { %s1536_s20 = smov %s1242_s15  ;;  %s1537_s21 = smov %s1090_s22 }
 0x398   : > { %s1538_s22 = smov %s1540_s9  ;;  %21 = sbr.rel (!%p19_p5) target bundleno = 7 (0x7), region = 90 }
 0x39f   :  { %695 = vsyncpa [#allocation3], 1 }
 0x3a0   :  { %697 = vsyncpa [#allocation3 + $0x1], 1 }
 0x3a1   :  { %698 = vsyncpa [#allocation6], 1 }
 0x3a2   :  { %699 = vsyncpa [#allocation4], 1 }
 0x3a3   :  { %701 = vsyncpa [#allocation4 + $0x1], 1 }

</bundles_post_ra>
